<compile_context>
chip_gen: v5e
topology: v5e:2x2
jax: 0.10.0
libtpu: 0.0.40
codegen_flags: <defaults>
</compile_context>

<pallas_src>
import jax
import jax.numpy as jnp
import numpy as np
from jax.experimental import pallas as pl
from jax.experimental.pallas import tpu as pltpu


def _additive_attn_kernel(tgt_ref,       # (TB, L, T)
                          q_ref,         # (TB, Q)
                          wq_ref,        # (Q, T)   attn_layer weight, query part
                          wt_ref,        # (T, T)   attn_layer weight, targets part
                          b_ref,         # (1, T)   attn_layer bias
                          v_ref,         # (1, T)   attn_v weight (row)
                          applied_ref,   # (TB, 1, T)
                          weights_ref):  # (TB, L)
    tgt = tgt_ref[...]                                   # (TB, L, T)
    TB, L, T = tgt.shape

    # ---- query contribution (split out of the concat): (TB, T) ----
    qc = jnp.dot(q_ref[...], wq_ref[...],
                 preferred_element_type=jnp.float32) + b_ref[...]

    # ---- targets projection: one MXU matmul over all TB*L rows ----
    kt = jnp.dot(tgt.reshape(TB * L, T), wt_ref[...],
                 preferred_element_type=jnp.float32)     # (TB*L, T)
    keyed = jnp.tanh(kt.reshape(TB, L, T) + qc[:, None, :])   # (TB, L, T)

    # ---- attention scores, lane-major over L: (TB, L) ----
    scores = jnp.sum(keyed * v_ref[...], axis=-1)        # contract T (VPU/XLU)

    # ---- softmax over L (lane reduce) ----
    m = jnp.max(scores, axis=-1, keepdims=True)
    e = jnp.exp(scores - m)
    s = jnp.sum(e, axis=-1, keepdims=True)
    w = e * pl.reciprocal(s, approx=True)                # (TB, L)

    # ---- applied = weights @ targets on the MXU (batched) ----
    applied = jnp.einsum('bml,blt->bmt', w[:, None, :], tgt,
                         preferred_element_type=jnp.float32)   # (TB, 1, T)

    applied_ref[...] = applied
    weights_ref[...] = w


def _pick_batch_tile(B, L):
    """Batch elements per grid step. Must divide B and be 8-aligned (or == B)."""
    if B <= 8 or B % 8 != 0:
        return B                     # whole batch in one grid step
    tb = 8
    for cand in range(8, min(B, 512) + 1, 8):
        if B % cand == 0 and cand * L <= 4096:
            tb = cand
    return tb


def additive_attention(query, targets, params, *, n_layers=1):
    """query (1,B,Q), targets (L,B,T) -> (applied (1,B,T), weights (B,1,L))."""
    assert n_layers == 1, "only the default n_layers=1 path is implemented"
    L, B, T = targets.shape
    Q = query.shape[-1]

    # Layout plumbing outside the kernel (XLA handles these transposes).
    tgt_b = jnp.transpose(targets, (1, 0, 2))            # (B, L, T)
    q_b = query[0]                                       # (B, Q)

    attn_w = params["attn_w"]                            # (Q+T, T), pre-transposed
    wq = attn_w[:Q]                                      # (Q, T)
    wt = attn_w[Q:]                                      # (T, T)
    bias = params["attn_b"].reshape(1, T)
    v_row = params["v_w"].reshape(1, T)                  # attn_v weight as a row

    TB = _pick_batch_tile(B, L)
    grid = (B // TB,)

    def const2d(shape):
        return pl.BlockSpec(shape, lambda i: (0, 0))

    grid_spec = pltpu.PrefetchScalarGridSpec(
        num_scalar_prefetch=0,
        grid=grid,
        in_specs=[
            pl.BlockSpec((TB, L, T), lambda i: (i, 0, 0)),   # targets tile
            pl.BlockSpec((TB, Q), lambda i: (i, 0)),         # query tile
            const2d((Q, T)),                                 # wq
            const2d((T, T)),                                 # wt
            const2d((1, T)),                                 # bias
            const2d((1, T)),                                 # v row
        ],
        out_specs=[
            pl.BlockSpec((TB, 1, T), lambda i: (i, 0, 0)),   # applied
            pl.BlockSpec((TB, L), lambda i: (i, 0)),         # weights (lane-dense L)
        ],
    )

    applied, weights = pl.pallas_call(
        _additive_attn_kernel,
        out_shape=(
            jax.ShapeDtypeStruct((B, 1, T), jnp.float32),
            jax.ShapeDtypeStruct((B, L), jnp.float32),
        ),
        grid_spec=grid_spec,
        compiler_params=pltpu.CompilerParams(
            dimension_semantics=("parallel",)),
    )(tgt_b, q_b, wq, wt, bias, v_row)

    attn_applied = jnp.transpose(applied, (1, 0, 2))     # (1, B, T)
    attn_weights = weights[:, None, :]                   # (B, 1, L)
    return attn_applied, attn_weights


def reference_forward(query, targets, params):
    """Plain-JAX mirror of the torch forward (n_layers=1), for verification."""
    L, B, T = targets.shape
    q_exp = jnp.broadcast_to(query, (L, B, query.shape[-1]))
    poids = jnp.concatenate([q_exp, targets], axis=2)              # (L, B, Q+T)
    poids = jnp.tanh(poids @ params["attn_w"] + params["attn_b"])  # (L, B, T)
    scores = poids @ params["v_w"]                                 # (L, B, 1)
    aw = jnp.transpose(scores, (1, 0, 2))                          # (B, L, 1)
    tgt_b = jnp.transpose(targets, (1, 0, 2))                      # (B, L, T)
    aw = jax.nn.softmax(aw, axis=1)
    aw = jnp.transpose(aw, (0, 2, 1))                              # (B, 1, L)
    applied = jnp.matmul(aw, tgt_b)                                # (B, 1, T)
    applied = jnp.transpose(applied, (1, 0, 2))                    # (1, B, T)
    return applied, aw


if __name__ == "__main__":
    B, L, T, Q = 2, 8, 32, 32

    key = jax.random.PRNGKey(0)
    ks = jax.random.split(key, 5)

    def lin_init(k, shape, fan_in):
        bound = 1.0 / np.sqrt(fan_in)
        return jax.random.uniform(k, shape, jnp.float32, -bound, bound)

    params = {
        # attn_layer: Linear(Q+T, T) with weight stored pre-transposed (in, out);
        # rows [:Q] multiply the query, rows [Q:] the targets (torch concat order).
        "attn_w": lin_init(ks[0], (Q + T, T), Q + T),
        "attn_b": lin_init(ks[1], (T,), Q + T),
        # attn_v: Linear(T, 1, bias=False)
        "v_w":    lin_init(ks[2], (T, 1), T),
    }

    query = jax.random.normal(ks[3], (1, B, Q), jnp.float32)
    targets = jax.random.normal(ks[4], (L, B, T), jnp.float32)

    applied, weights = additive_attention(query, targets, params)
    jax.block_until_ready((applied, weights))

    ref_applied, ref_weights = reference_forward(query, targets, params)
    np.testing.assert_allclose(np.asarray(applied), np.asarray(ref_applied),
                               rtol=2e-3, atol=2e-4)
    np.testing.assert_allclose(np.asarray(weights), np.asarray(ref_weights),
                               rtol=2e-3, atol=2e-4)

    print("KERNEL_OK")
</pallas_src>

<mosaic_0001>
module attributes {stable_mosaic.version = 11 : i64} {
  func.func @_additive_attn_kernel(%arg0: i32, %arg1: memref<2x8x32xf32, #tpu.memory_space<vmem>>, %arg2: memref<2x32xf32, #tpu.memory_space<vmem>>, %arg3: memref<32x32xf32, #tpu.memory_space<vmem>>, %arg4: memref<32x32xf32, #tpu.memory_space<vmem>>, %arg5: memref<1x32xf32, #tpu.memory_space<vmem>>, %arg6: memref<1x32xf32, #tpu.memory_space<vmem>>, %arg7: memref<2x1x32xf32, #tpu.memory_space<vmem>>, %arg8: memref<2x8xf32, #tpu.memory_space<vmem>>) attributes {dimension_semantics = [#tpu.dimension_semantics<parallel>], iteration_bounds = array<i64: 1>, scalar_prefetch = 0 : i64, scratch_operands = 0 : i64, tpu.core_type = #tpu.core_type<tc>, window_params = [{transform_indices = @transform_0, window_bounds = array<i64: 2, 8, 32>}, {transform_indices = @transform_1, window_bounds = array<i64: 2, 32>}, {pipeline_mode = #tpu.pipeline_mode<synchronous>, transform_indices = @transform_2, window_bounds = array<i64: 32, 32>}, {pipeline_mode = #tpu.pipeline_mode<synchronous>, transform_indices = @transform_3, window_bounds = array<i64: 32, 32>}, {pipeline_mode = #tpu.pipeline_mode<synchronous>, transform_indices = @transform_4, window_bounds = array<i64: 1, 32>}, {pipeline_mode = #tpu.pipeline_mode<synchronous>, transform_indices = @transform_5, window_bounds = array<i64: 1, 32>}, {transform_indices = @transform_6, window_bounds = array<i64: 2, 1, 32>}, {transform_indices = @transform_7, window_bounds = array<i64: 2, 8>}]} {
    %c0 = arith.constant 0 : index
    %c0_0 = arith.constant 0 : index
    %c0_1 = arith.constant 0 : index
    %0 = vector.load %arg1[%c0, %c0_0, %c0_1] : memref<2x8x32xf32, #tpu.memory_space<vmem>>, vector<2x8x32xf32>
    %c0_2 = arith.constant 0 : index
    %c0_3 = arith.constant 0 : index
    %1 = vector.load %arg2[%c0_2, %c0_3] : memref<2x32xf32, #tpu.memory_space<vmem>>, vector<2x32xf32>
    %c0_4 = arith.constant 0 : index
    %c0_5 = arith.constant 0 : index
    %2 = vector.load %arg3[%c0_4, %c0_5] : memref<32x32xf32, #tpu.memory_space<vmem>>, vector<32x32xf32>
    %cst = arith.constant dense<0.000000e+00> : vector<2x32xf32>
    %3 = tpu.matmul %1, %2, %cst {dimension_numbers = #tpu.dot_dimension_numbers<[1], [0], [0], [1], [0, 0, 1, 1], [], []>} : vector<2x32xf32>, vector<32x32xf32>, vector<2x32xf32> -> vector<2x32xf32>
    %c0_6 = arith.constant 0 : index
    %c0_7 = arith.constant 0 : index
    %4 = vector.load %arg5[%c0_6, %c0_7] : memref<1x32xf32, #tpu.memory_space<vmem>>, vector<1x32xf32>
    %5 = vector.broadcast %4 : vector<1x32xf32> to vector<2x32xf32>
    %6 = arith.addf %3, %5 : vector<2x32xf32>
    %7 = vector.shape_cast %0 : vector<2x8x32xf32> to vector<16x32xf32>
    %c0_8 = arith.constant 0 : index
    %c0_9 = arith.constant 0 : index
    %8 = vector.load %arg4[%c0_8, %c0_9] : memref<32x32xf32, #tpu.memory_space<vmem>>, vector<32x32xf32>
    %cst_10 = arith.constant dense<0.000000e+00> : vector<16x32xf32>
    %9 = tpu.matmul %7, %8, %cst_10 {dimension_numbers = #tpu.dot_dimension_numbers<[1], [0], [0], [1], [0, 0, 1, 1], [], []>} : vector<16x32xf32>, vector<32x32xf32>, vector<16x32xf32> -> vector<16x32xf32>
    %10 = vector.shape_cast %9 : vector<16x32xf32> to vector<2x8x32xf32>
    %11 = vector.shape_cast %6 : vector<2x32xf32> to vector<2x1x32xf32>
    %12 = vector.broadcast %11 : vector<2x1x32xf32> to vector<2x8x32xf32>
    %13 = arith.addf %10, %12 : vector<2x8x32xf32>
    %14 = math.tanh %13 : vector<2x8x32xf32>
    %c0_11 = arith.constant 0 : index
    %c0_12 = arith.constant 0 : index
    %15 = vector.load %arg6[%c0_11, %c0_12] : memref<1x32xf32, #tpu.memory_space<vmem>>, vector<1x32xf32>
    %16 = vector.shape_cast %15 : vector<1x32xf32> to vector<1x1x32xf32>
    %17 = vector.broadcast %16 : vector<1x1x32xf32> to vector<2x8x32xf32>
    %18 = arith.mulf %14, %17 : vector<2x8x32xf32>
    %cst_13 = arith.constant dense<0.000000e+00> : vector<2x8xf32>
    %19 = vector.multi_reduction <add>, %18, %cst_13 [2] : vector<2x8x32xf32> to vector<2x8xf32>
    %cst_14 = arith.constant dense<0xFF800000> : vector<2xf32>
    %20 = vector.multi_reduction <maximumf>, %19, %cst_14 [1] : vector<2x8xf32> to vector<2xf32>
    %21 = vector.shape_cast %20 : vector<2xf32> to vector<2x1xf32>
    %22 = vector.broadcast %21 : vector<2x1xf32> to vector<2x8xf32>
    %23 = arith.subf %19, %22 : vector<2x8xf32>
    %24 = math.exp %23 : vector<2x8xf32>
    %cst_15 = arith.constant dense<0.000000e+00> : vector<2xf32>
    %25 = vector.multi_reduction <add>, %24, %cst_15 [1] : vector<2x8xf32> to vector<2xf32>
    %26 = vector.shape_cast %25 : vector<2xf32> to vector<2x1xf32>
    %27 = tpu.reciprocal %26 {approx = true} : vector<2x1xf32> -> vector<2x1xf32>
    %28 = vector.broadcast %27 : vector<2x1xf32> to vector<2x8xf32>
    %29 = arith.mulf %24, %28 : vector<2x8xf32>
    %30 = vector.shape_cast %29 : vector<2x8xf32> to vector<2x1x8xf32>
    "tpu.trace_start"() <{level = 10 : i32, message = "bml,blt->bmt"}> : () -> ()
    %cst_16 = arith.constant dense<0.000000e+00> : vector<2x1x32xf32>
    %31 = tpu.matmul %30, %0, %cst_16 {dimension_numbers = #tpu.dot_dimension_numbers<[2], [1], [1], [2], [0, 0, 0, 1, 1, 2], [0], [0]>} : vector<2x1x8xf32>, vector<2x8x32xf32>, vector<2x1x32xf32> -> vector<2x1x32xf32>
    "tpu.trace_stop"() : () -> ()
    %c0_17 = arith.constant 0 : index
    %c0_18 = arith.constant 0 : index
    %c0_19 = arith.constant 0 : index
    %32 = vector.load %arg7[%c0_17, %c0_18, %c0_19] : memref<2x1x32xf32, #tpu.memory_space<vmem>>, vector<2x1x32xf32>
    tpu.vector_store %arg7[%c0_17, %c0_18, %c0_19], %31 {strides = array<i32>} : memref<2x1x32xf32, #tpu.memory_space<vmem>>, vector<2x1x32xf32>,
    %c0_20 = arith.constant 0 : index
    %c0_21 = arith.constant 0 : index
    %33 = vector.load %arg8[%c0_20, %c0_21] : memref<2x8xf32, #tpu.memory_space<vmem>>, vector<2x8xf32>
    tpu.vector_store %arg8[%c0_20, %c0_21], %29 {strides = array<i32>} : memref<2x8xf32, #tpu.memory_space<vmem>>, vector<2x8xf32>,
    return
  }
  func.func @transform_0(%arg0: i32) -> (i32, i32, i32) {
    %c0_i32 = arith.constant 0 : i32
    %c0_i32_0 = arith.constant 0 : i32
    %c0_i32_1 = arith.constant 0 : i32
    return %arg0, %c0_i32, %c0_i32_0 : i32, i32, i32
  }
  func.func @transform_1(%arg0: i32) -> (i32, i32) {
    %c0_i32 = arith.constant 0 : i32
    %c0_i32_0 = arith.constant 0 : i32
    return %arg0, %c0_i32 : i32, i32
  }
  func.func @transform_2(%arg0: i32) -> (i32, i32) {
    %c0_i32 = arith.constant 0 : i32
    %c0_i32_0 = arith.constant 0 : i32
    %c0_i32_1 = arith.constant 0 : i32
    return %c0_i32, %c0_i32_0 : i32, i32
  }
  func.func @transform_3(%arg0: i32) -> (i32, i32) {
    %c0_i32 = arith.constant 0 : i32
    %c0_i32_0 = arith.constant 0 : i32
    %c0_i32_1 = arith.constant 0 : i32
    return %c0_i32, %c0_i32_0 : i32, i32
  }
  func.func @transform_4(%arg0: i32) -> (i32, i32) {
    %c0_i32 = arith.constant 0 : i32
    %c0_i32_0 = arith.constant 0 : i32
    %c0_i32_1 = arith.constant 0 : i32
    return %c0_i32, %c0_i32_0 : i32, i32
  }
  func.func @transform_5(%arg0: i32) -> (i32, i32) {
    %c0_i32 = arith.constant 0 : i32
    %c0_i32_0 = arith.constant 0 : i32
    %c0_i32_1 = arith.constant 0 : i32
    return %c0_i32, %c0_i32_0 : i32, i32
  }
  func.func @transform_6(%arg0: i32) -> (i32, i32, i32) {
    %c0_i32 = arith.constant 0 : i32
    %c0_i32_0 = arith.constant 0 : i32
    %c0_i32_1 = arith.constant 0 : i32
    return %arg0, %c0_i32, %c0_i32_0 : i32, i32, i32
  }
  func.func @transform_7(%arg0: i32) -> (i32, i32) {
    %c0_i32 = arith.constant 0 : i32
    %c0_i32_0 = arith.constant 0 : i32
    return %arg0, %c0_i32 : i32, i32
  }
}

</mosaic_0001>

<bundles_post_ra>
// kernel: tpu_custom_call.1
= control target key start
LH: loop header
LB: loop body
LE: loop exit
PB: predicated region body
PF: predicated region fallthrough
CT: control target
= control target key end

     0   :  { %13 = vsyncpa [#allocation3], 0  ;;  %s594_s0 = inlined_call_operand.hbm [shape: f32[2,8,32], index: 0, kind: input, shape index: {}]   ;;  %s595_s1 = inlined_call_operand.hbm [shape: f32[2,32], index: 1, kind: input, shape index: {}]   ;;  %s596_s2 = inlined_call_operand.hbm [shape: f32[32,32], index: 2, kind: input, shape index: {}]   ;;  %s597_s3 = inlined_call_operand.hbm [shape: f32[32,32], index: 3, kind: input, shape index: {}]   ;;  %s598_s4 = inlined_call_operand.vmem [shape: f32[1,32], index: 4, kind: input, shape index: {}]   ;;  %s599_s5 = inlined_call_operand.vmem [shape: f32[1,32], index: 5, kind: input, shape index: {}]   ;;  %s600_s6 = inlined_call_operand.hbm [shape: f32[2,1,32], index: 6, kind: output, shape index: {0}]   ;;  %s601_s7 = inlined_call_operand.hbm [shape: f32[2,8], index: 7, kind: output, shape index: {1}]  }
   0x1   :  { %14 = vsyncpa [#allocation6], 0 }
   0x2   :  { %15 = vsyncpa [#allocation9], 0 }
   0x3   :  { %16 = vsyncpa [#allocation4], 0  ;;  %s36_s26 = sshll.u32 %s595_s1, 4  ;;  %s37_s26 = int_to_ptr.hbm [resolvable:$true] %s36_s26 }
   0x4   :  { %17 = vsyncpa [#allocation12], 0  ;;  %s508_s27 = smov [#allocation5]   ;;  %s22_s8 = sshll.u32 %s594_s0, 4  ;;  %s23_s8 = int_to_ptr.hbm [resolvable:$true] %s22_s8 }
   0x5   :  { %s38_s28 = sshll.u32 %s508_s27, 4  ;;  %s509_s9 = smov [#allocation2]   ;;  %s39_s28 = int_to_ptr.vmem [resolvable:$true] %s38_s28 }
   0x6   :  { %41 = dma.hbm_to_vmem [thread:$0]  %s37_s26, 32, %s39_s28, [#allocation6]  }
   0x7   :  { %s24_s10 = sshll.u32 %s509_s9, 4  ;;  %s510_s11 = smov 128   ;;  %s25_s10 = int_to_ptr.vmem [resolvable:$true] %s24_s10 }
   0x8   :  { %s511_s12 = smov 8   ;;  %s46_s1 = sshll.u32 %s596_s2, 4  ;;  %s47_s1 = int_to_ptr.hbm [resolvable:$true] %s46_s1 }
   0x9   :  { %30 = dma.hbm_to_vmem [thread:$0]  %s23_s8, 256, %s25_s10, [#allocation3], %s510_s11, %s510_s11, %s511_s12  }
   0xa   :  { %s512_s15 = smov [#allocation7]   ;;  %s59_s0 = sshll.u32 %s597_s3, 4  ;;  %s60_s0 = int_to_ptr.hbm [resolvable:$true] %s59_s0 }
   0xb   :  { %s48_s16 = sshll.u32 %s512_s15, 4  ;;  %s513_s19 = smov [#allocation8]   ;;  %s49_s16 = int_to_ptr.vmem [resolvable:$true] %s48_s16 }
   0xc   :  { %54 = dma.hbm_to_vmem [thread:$0]  %s47_s1, 512, %s49_s16, [#allocation6], %s510_s11, %s510_s11, %s511_s12  }
   0xd   :  { %s61_s20 = sshll.u32 %s513_s19, 4  ;;  %s62_s20 = int_to_ptr.vmem [resolvable:$true] %s61_s20 }
   0xe   :  { %67 = dma.hbm_to_vmem [thread:$0]  %s60_s0, 512, %s62_s20, [#allocation9], %s510_s11, %s510_s11, %s511_s12  }
   0xf   :  { %498 = dma.done.wait [#allocation3], 256  }
  0x10   :  { %499 = vsyncadd [#allocation3], 4294967040 }
  0x11   :  { %500 = dma.done.wait [#allocation6], 544  }
  0x12   :  { %501 = vsyncadd [#allocation6], 4294966752 }
  0x13   :  { %502 = dma.done.wait [#allocation9], 512  }
  0x14   :  { %503 = vsyncadd [#allocation9], 4294966784  ;;  %v94_v0 = vld [vmem:[#allocation7 + $0x18] sm:$0xff]  ;;  %v93_v2 = vld [vmem:[#allocation7 + $0x10] sm:$0xff]  ;;  %vm99_vm0 = vcmask 261120   ;;  %v180_v29 = vlaneseq  ;;  %vm184_vm1 = vcmask 1041409  }
  0x15   :  { %v126_v1 = vld [vmem:[#allocation8 + $0x18] sm:$0xff]  ;;  %115 = vmatpush.msra.mxu0 %v94_v0  ;;  %v125_v3 = vld [vmem:[#allocation8 + $0x10] sm:$0xff]  ;;  %v92_v4 = vld [vmem:[#allocation7 + $0x8] sm:$0xff]  ;;  %vm187_vm2 = vcmask 58368   ;;  %v514_v36 = vmov 0   ;;  %vm230_vm3 = vcmask 64512  }
  0x16   :  { %145 = vmatpush.msra.mxu1 %v126_v1  ;;  %v124_v5 = vld [vmem:[#allocation8 + $0x8] sm:$0xff]  ;;  %v89_v7 = vld [vmem:[#allocation2 + $0x8] sm:$0xff]  ;;  %v91_v8 = vld [vmem:[#allocation7] sm:$0xff]  ;;  %v181_v30 = vand.u32 127, %v180_v29  ;;  %340 = vset.pattern.permute.xlu2 %v514_v36  ;;  %s306_s25 = sshll.u32 %s601_s7, 4  ;;  %s516_s26 = smov [#allocation10]   ;;  %s307_s25 = int_to_ptr.hbm [resolvable:$true] %s306_s25 }
  0x17   :  { %116 = vmatpush.msra.mxu0 %v93_v2  ;;  %v88_v6 = vld [vmem:[#allocation2] sm:$0xff]  ;;  %v123_v9 = vld [vmem:[#allocation8] sm:$0xff]  ;;  %275 = vmatpush.msra.mxu3 %v89_v7  ;;  %v90_v10 = vld [vmem:[#allocation5] sm:$0x3]  ;;  %s290_s27 = sshll.u32 %s516_s26, 4  ;;  %s292_s30 = sshll.u32 %s600_s6, 4  ;;  %s291_s27 = int_to_ptr.vmem [resolvable:$true] %s290_s27  ;;  %s293_s30 = int_to_ptr.hbm [resolvable:$true] %s292_s30 }
  0x18   :  { %146 = vmatpush.msra.mxu1 %v125_v3  ;;  %248 = vmatpush.msra.mxu2 %v88_v6  ;;  %v342_v11 = vld [vmem:[%s598_s4] ss:$0 sm:$0xff]  ;;  %s515_s4 = smov [#allocation11]   ;;  %vm280_vm4 = vcmask 253952   ;;  %s517_s8 = smov 16  }
  0x19   :  { %117 = vmatpush.msra.mxu0 %v92_v4  ;;  %v343_v21 = vld [vmem:[%s599_s5] ss:$0 sm:$0xff]  ;;  %339 = vset.pattern.permute.xlu1 %v514_v36  ;;  %s304_s5 = sshll.u32 %s515_s4, 4  ;;  %s518_s9 = smov 1   ;;  %s305_s5 = int_to_ptr.vmem [resolvable:$true] %s304_s5 }
  0x1a   :  { %147 = vmatpush.msra.mxu1 %v124_v5  ;;  %341 = vset.pattern.permute.xlu0 %v514_v36 }
  0x1b   :  { %118 = vmatpush.msra.mxu0 %v91_v8 }
  0x1c   :  { %148 = vmatpush.msra.mxu1 %v123_v9  ;;  %323 = vmatmul.msk.f32.vlgmr.msra.gmra.mxu0 %vm99_vm0, %v90_v10 }
  0x1d   :  { %324 = vmatmul.msk.f32.vlgmr.msra.gmra.mxu1 %vm99_vm0, %v88_v6 }
  0x25   :  { %325 = vmatmul.msk.f32.gmra.mxu1 %vm99_vm0, %v89_v7 }
  0x99   :  { %v120_v12 = vpop.f32.mrf.mxu0 }
  0x9a   :  { %v150_v13 = vpop.f32.mrf.mxu1  ;;  %v121_v14 = vadd.f32 %v342_v11, %v120_v12 }
  0x9c   :  { %v157_v15 = vrot.slane %v121_v14, 1  ;;  %v158_v16 = vperm.slane %v121_v14, 0 }
  0x9e   :  { %v162_v17 = vadd.f32 %v158_v16, %v150_v13  ;;  %v159_v18 = vperm.slane %v157_v15, 0 }
  0xa0   :  { %344 = vtanh.f32 %v162_v17 }
  0xa2   :  { %v153_v19 = vpop.f32.mrf.mxu1 }
  0xa3   :  { %v163_v20 = vadd.f32 %v159_v18, %v153_v19 }
  0xa5   :  { %346 = vtanh.f32 %v163_v20 }
  0xa6   :  { %v345_v22 = vpop.eup %344 }
  0xa7   :  { %v170_v23 = vmul.f32 %v345_v22, %v343_v21 }
  0xa9   :  { %v172_v24 = vsel %vm99_vm0, %v170_v23, 0.0 }
  0xaa   :  { %173 = vadd.xlane.f32.xlu0 %v172_v24 }
  0xab   :  { %v347_v25 = vpop.eup %346 }
  0xac   :  { %v171_v26 = vmul.f32 %v347_v25, %v343_v21 }
  0xae   :  { %v175_v27 = vsel %vm99_vm0, %v171_v26, 0.0 }
  0xb2   :  { %176 = vadd.xlane.f32.xlu0 %v175_v27 }
 0x11d   :  { %v174_v28 = vpop.xlane.xlu0 %173 }
 0x11e   :  { %v182_v32 = vperm.slane %v174_v28, %v181_v30 }
 0x125   :  { %v177_v31 = vpop.xlane.xlu0 %176 }
 0x126   :  { %v183_v33 = vperm.slane %v177_v31, %v181_v30 }
 0x128   :  { %v185_v34 = vsel %vm184_vm1, %v183_v33, %v182_v32 }
 0x129   :  { %v188_v35 = vsel %vm187_vm2, %v185_v34, -inf }
 0x12a   :  { %189 = vmax.xlane.f32.xlu1 %v188_v35 }
 0x19d   :  { %v190_v37 = vpop.xlane.xlu1 %189 }
 0x19e   :  { %v192_v38 = vperm.slane %v190_v37, 0  ;;  %v193_v39 = vperm.slane %v190_v37, 1 }
 0x1a0   :  { %v196_v40 = vsub.f32 %v174_v28, %v192_v38  ;;  %v197_v41 = vsub.f32 %v177_v31, %v193_v39 }
 0x1a2   :  { %v198_v42 = vmul.f32 1.442695, %v196_v40  ;;  %v200_v43 = vmul.f32 1.442695, %v197_v41 }
 0x1a4   :  { %348 = vpow2.f32 %v198_v42 }
 0x1a5   :  { %350 = vpow2.f32 %v200_v43 }
 0x1aa   :  { %v349_v44 = vpop.eup %348 }
 0x1ab   :  { %v351_v45 = vpop.eup %350  ;;  %205 = vperm.xlu1 %339, %v349_v44  }
 0x1ac   :  { %208 = vperm.xlu2 %340, %v351_v45  }
 0x206   :  { %v209_v46 = vpop.permute.xlu2 %208 }
 0x207   :  { %v211_v48 = vperm.slane %v209_v46, %v181_v30 }
 0x21d   :  { %v206_v47 = vpop.permute.xlu1 %205 }
 0x21e   :  { %v210_v49 = vperm.slane %v206_v47, %v181_v30 }
 0x220   :  { %v212_v50 = vsel %vm184_vm1, %v211_v48, %v210_v49 }
 0x221   :  { %v214_v51 = vsel %vm187_vm2, %v212_v50, 0.0 }
 0x222   :  { %215 = vadd.xlane.f32.xlu2 %v214_v51 }
 0x295   :  { %v216_v52 = vpop.xlane.xlu2 %215 }
 0x296   :  { %352 = vrcp.f32 %v216_v52 }
 0x29c   :  { %v353_v53 = vpop.eup %352 }
 0x29d   :  { %v220_v54 = vperm.slane %v353_v53, 1  ;;  %v219_v55 = vperm.slane %v353_v53, 0 }
 0x29f   :  { %v224_v56 = vmul.f32 %v351_v45, %v220_v54  ;;  %v223_v57 = vmul.f32 %v349_v44, %v219_v55 }
 0x2a1   :  { %255 = vperm.xlu1 %339, %v224_v56   ;;  %227 = vperm.xlu0 %341, %v223_v57  }
 0x313   :  { %v256_v58 = vpop.permute.xlu1 %255  ;;  %v228_v59 = vpop.permute.xlu0 %227 }
 0x314   :  { %v257_v60 = vperm.slane %v256_v58, %v181_v30  ;;  %v229_v61 = vperm.slane %v228_v59, %v181_v30 }
 0x316   :  { %v283_v62 = vsel %vm184_vm1, %v257_v60, %v229_v61  ;;  %326 = vmatmul.msk.f32.vlgmr.msra.gmra.mxu2 %vm230_vm3, %v229_v61  ;;  %327 = vmatmul.msk.f32.vlgmr.msra.gmra.mxu3 %vm230_vm3, %v257_v60 }
 0x317   :  { %285 = vst.msk [vmem:[#allocation11] sm:$0x3] %vm187_vm2, %v283_v62 }
 0x318   :  { %309 = dma.vmem_to_hbm [thread:$0]  %s305_s5, 32, %s307_s25, [#allocation12]  }
 0x399   :  { %v250_v63 = vpop.f32.mrf.mxu2  ;;  %v277_v0 = vpop.f32.mrf.mxu3 }
 0x39a   :  { %281 = vst.msk [vmem:[#allocation10] sm:$0x1] %vm280_vm4, %v250_v63 }
 0x39b   :  { %282 = vst.msk [vmem:[#allocation10 + $0x1] sm:$0x1] %vm280_vm4, %v277_v0 }
 0x39c   :  { %298 = dma.vmem_to_hbm [thread:$0]  %s291_s27, 32, %s293_s30, [#allocation4], %s517_s8, %s517_s8, %s518_s9  }
 0x39d   :  { %504 = dma.done.wait [#allocation4], 32  }
 0x39e   :  { %505 = vsyncadd [#allocation4], 4294967264 }
 0x39f   :  { %506 = dma.done.wait [#allocation12], 32  }
 0x3a0   :  { %507 = vsyncadd [#allocation12], 4294967264 }
 0x3a1   :  { %318 = vsyncpa [#allocation3], 1 }
 0x3a2   :  { %319 = vsyncpa [#allocation6], 1 }
 0x3a3   :  { %320 = vsyncpa [#allocation9], 1 }
 0x3a4   :  { %321 = vsyncpa [#allocation4], 1 }
 0x3a5   :  { %322 = vsyncpa [#allocation12], 1 }

</bundles_post_ra>
